<compile_context>
chip_gen: v7x
topology: tpu7x:2x2x1
jax: 0.10.0
libtpu: 0.0.40
codegen_flags: <defaults>
</compile_context>

<pallas_src>
import jax
import jax.numpy as jnp
from jax.experimental import pallas as pl
from jax.experimental.pallas import tpu as pltpu

LANE = 128      # vreg lane width (last dim)
BF16_TILE = 16  # bf16 sublane-packing tile (second-to-last dim)


def _round_up(n, m):
    return ((n + m - 1) // m) * m


def _mlp_kernel(x_ref, w1_ref, b1_ref, w2_ref, b2_ref, w3_ref, b3_ref, o_ref):
    # x / w* are in the compute dtype (bf16); accumulate in f32 on the MXU.
    # Biases are f32; bias-add and ReLU run in the f32 accumulator.
    x = x_ref[...]

    h1 = jnp.dot(x, w1_ref[...], preferred_element_type=jnp.float32) + b1_ref[...]
    h1 = jnp.maximum(h1, 0.0)

    h2 = jnp.dot(h1.astype(w2_ref.dtype), w2_ref[...],
                 preferred_element_type=jnp.float32) + b2_ref[...]
    h2 = jnp.maximum(h2, 0.0)

    out = jnp.dot(h2.astype(w3_ref.dtype), w3_ref[...],
                  preferred_element_type=jnp.float32) + b3_ref[...]
    o_ref[...] = out.astype(o_ref.dtype)


def _vmem_budgets():
    """Generation-aware VMEM limits: ~96/80 MiB on 128 MiB chips, ~48/40 MiB on v7x."""
    cap = None
    try:
        cap = int(pltpu.get_tpu_info().vmem_capacity_bytes)
    except Exception:
        cap = None
    if not cap:
        cap = 64 * 1024 * 1024               # conservative fallback: v7x per-TC VMEM
    limit = (cap * 3) // 4                   # scoped vmem_limit_bytes
    budget = (limit * 5) // 6                # tile-picker working-set budget (headroom)
    return limit, budget


def _pick_batch_tile(B, d_in, h1_p, h2_p, d_out_p, act_bytes, vmem_budget_bytes):
    """Largest batch tile (multiple of 256 preferred, floor 16) whose working set fits."""
    # Resident weights/biases are single-buffered (pl.Buffered(1)).
    w_bytes = ((d_in * h1_p + h1_p * h2_p + h2_p * d_out_p) * act_bytes
               + (h1_p + h2_p + d_out_p) * 4)
    # Cap tb so large batches always split into >= 2 grid steps (keeps both
    # TensorCores busy on v7x under dimension_semantics=("parallel",)).
    if B >= 512:
        tb_cap = _round_up(-(-B // 2), 256)
    else:
        tb_cap = _round_up(B, BF16_TILE)
    candidates = (8192, 4096, 2048, 1024, 512, 256, 128, 64, 32, 16)
    for tb in candidates:
        if tb > tb_cap:
            continue
        io_bytes = 2 * tb * (d_in + d_out_p) * act_bytes       # x / out, double-buffered
        scratch = tb * (h1_p + h2_p + d_out_p) * 4             # f32 intermediates
        if w_bytes + io_bytes + scratch <= vmem_budget_bytes:
            return tb
    return BF16_TILE


def linear_nn_forward(x, params, *, compute_dtype=jnp.bfloat16):
    """params = (w1, b1, w2, b2, w3, b3); w_k: [in, out], b_k: [out]."""
    w1, b1, w2, b2, w3, b3 = params
    B, D_in = x.shape
    H1, H2, D_out = w1.shape[1], w2.shape[1], w3.shape[1]

    # Pad hidden/output feature dims to 128-lane multiples (zero padding keeps the math
    # exact); x's feature dim is left at D_in (full-array last dim is a legal BlockSpec).
    h1_p = _round_up(H1, LANE)
    h2_p = _round_up(H2, LANE)
    d_out_p = _round_up(D_out, LANE)

    act_bytes = jnp.dtype(compute_dtype).itemsize
    vmem_limit, vmem_budget = _vmem_budgets()
    tb = _pick_batch_tile(B, D_in, h1_p, h2_p, d_out_p, act_bytes, vmem_budget)
    # Note: for very large H1/H2 the resident weights could exceed the v7x budget; a
    # K/N-tiled inner loop (pltpu.emit_pipeline) would be needed there.

    n_tiles = -(-B // tb)
    if n_tiles > 1 and n_tiles % 2 == 1 and tb * 8 <= B:
        n_tiles += 1   # even step count -> balanced across v7x's 2 TCs (<= ~12.5% pad)
    b_p = n_tiles * tb

    def pad2(a, rows, cols, dtype):
        a = a.astype(dtype)
        return jnp.pad(a, ((0, rows - a.shape[0]), (0, cols - a.shape[1])))

    x_p = pad2(x, b_p, D_in, compute_dtype)                 # pad batch rows only
    w1_p = pad2(w1, D_in, h1_p, compute_dtype)
    w2_p = pad2(w2, h1_p, h2_p, compute_dtype)
    w3_p = pad2(w3, h2_p, d_out_p, compute_dtype)
    b1_p = pad2(b1.reshape(1, -1), 1, h1_p, jnp.float32)
    b2_p = pad2(b2.reshape(1, -1), 1, h2_p, jnp.float32)
    b3_p = pad2(b3.reshape(1, -1), 1, d_out_p, jnp.float32)

    # Weights/biases: constant index_map (DMA'd once, reused every step), single-buffered.
    def resident(shape):
        return pl.BlockSpec(shape, lambda i: (0, 0), pipeline_mode=pl.Buffered(1))

    flops = 2 * b_p * (D_in * h1_p + h1_p * h2_p + h2_p * d_out_p)
    bytes_accessed = (b_p * D_in * act_bytes
                      + (D_in * h1_p + h1_p * h2_p + h2_p * d_out_p) * act_bytes
                      + (h1_p + h2_p + d_out_p) * 4
                      + b_p * d_out_p * act_bytes)

    out_p = pl.pallas_call(
        _mlp_kernel,
        out_shape=jax.ShapeDtypeStruct((b_p, d_out_p), compute_dtype),
        grid_spec=pl.GridSpec(
            grid=(n_tiles,),
            in_specs=[
                pl.BlockSpec((tb, D_in), lambda i: (i, 0)),   # x: tiled over batch
                resident((D_in, h1_p)),
                resident((1, h1_p)),
                resident((h1_p, h2_p)),
                resident((1, h2_p)),
                resident((h2_p, d_out_p)),
                resident((1, d_out_p)),
            ],
            out_specs=pl.BlockSpec((tb, d_out_p), lambda i: (i, 0)),
        ),
        compiler_params=pltpu.CompilerParams(
            dimension_semantics=("parallel",),     # shard batch tiles across TCs (v7x)
            vmem_limit_bytes=vmem_limit,           # generation-aware scoped VMEM limit
        ),
        cost_estimate=pl.CostEstimate(
            flops=flops, transcendentals=0, bytes_accessed=bytes_accessed),
    )(x_p, w1_p, b1_p, w2_p, b2_p, w3_p, b3_p)

    return out_p[:B, :D_out].astype(x.dtype)


def init_linear_nn_params(key, D_in, H1, H2, D_out, dtype=jnp.float32):
    """Deterministic init mimicking PyTorch nn.Linear default U[-1/sqrt(fan_in), +1/sqrt(fan_in)]."""
    def init_layer(k, fan_in, fan_out):
        kw, kb = jax.random.split(k)
        bound = 1.0 / jnp.sqrt(fan_in)
        w = jax.random.uniform(kw, (fan_in, fan_out), dtype, -bound, bound)
        b = jax.random.uniform(kb, (fan_out,), dtype, -bound, bound)
        return w, b

    k1, k2, k3 = jax.random.split(key, 3)
    w1, b1 = init_layer(k1, D_in, H1)
    w2, b2 = init_layer(k2, H1, H2)
    w3, b3 = init_layer(k3, H2, D_out)
    return (w1, b1, w2, b2, w3, b3)


def _reference_forward(x, params, compute_dtype=jnp.bfloat16):
    """Same math path as the kernel: bf16 matmul operands, f32 accumulate, bf16 output."""
    w1, b1, w2, b2, w3, b3 = params
    c = lambda a: a.astype(compute_dtype)
    h1 = jnp.maximum(jnp.dot(c(x), c(w1), preferred_element_type=jnp.float32) + b1, 0.0)
    h2 = jnp.maximum(jnp.dot(c(h1), c(w2), preferred_element_type=jnp.float32) + b2, 0.0)
    out = jnp.dot(c(h2), c(w3), preferred_element_type=jnp.float32) + b3
    return out.astype(compute_dtype).astype(x.dtype)


if __name__ == "__main__":
    # Small shapes consistent with the module: batch=8, D_in=32, H1=64, H2=64, D_out=16
    B, D_in, H1, H2, D_out = 8, 32, 64, 64, 16

    key = jax.random.PRNGKey(0)
    kx, kp = jax.random.split(key)
    x = jax.random.normal(kx, (B, D_in), dtype=jnp.float32)
    params = init_linear_nn_params(kp, D_in, H1, H2, D_out)

    out = linear_nn_forward(x, params)
    out = jax.block_until_ready(out)

    ref = _reference_forward(x, params)
    assert out.shape == (B, D_out)
    assert jnp.allclose(out, ref, atol=5e-3, rtol=5e-3), "Pallas output mismatch vs reference"

    print("KERNEL_OK")
</pallas_src>

<mosaic_0001>
module attributes {stable_mosaic.version = 11 : i64} {
  func.func @_mlp_kernel(%arg0: i32, %arg1: memref<16x32xbf16, #tpu.memory_space<vmem>>, %arg2: memref<32x128xbf16, #tpu.memory_space<vmem>>, %arg3: memref<1x128xf32, #tpu.memory_space<vmem>>, %arg4: memref<128x128xbf16, #tpu.memory_space<vmem>>, %arg5: memref<1x128xf32, #tpu.memory_space<vmem>>, %arg6: memref<128x128xbf16, #tpu.memory_space<vmem>>, %arg7: memref<1x128xf32, #tpu.memory_space<vmem>>, %arg8: memref<16x128xbf16, #tpu.memory_space<vmem>>) attributes {dimension_semantics = [#tpu.dimension_semantics<parallel>], iteration_bounds = array<i64: 1>, scalar_prefetch = 0 : i64, scratch_operands = 0 : i64, tpu.core_type = #tpu.core_type<tc>, window_params = [{transform_indices = @transform_0, window_bounds = array<i64: 16, 32>}, {pipeline_mode = #tpu.pipeline_mode<synchronous>, transform_indices = @transform_1, window_bounds = array<i64: 32, 128>}, {pipeline_mode = #tpu.pipeline_mode<synchronous>, transform_indices = @transform_2, window_bounds = array<i64: 1, 128>}, {pipeline_mode = #tpu.pipeline_mode<synchronous>, transform_indices = @transform_3, window_bounds = array<i64: 128, 128>}, {pipeline_mode = #tpu.pipeline_mode<synchronous>, transform_indices = @transform_4, window_bounds = array<i64: 1, 128>}, {pipeline_mode = #tpu.pipeline_mode<synchronous>, transform_indices = @transform_5, window_bounds = array<i64: 128, 128>}, {pipeline_mode = #tpu.pipeline_mode<synchronous>, transform_indices = @transform_6, window_bounds = array<i64: 1, 128>}, {transform_indices = @transform_7, window_bounds = array<i64: 16, 128>}]} {
    %c0 = arith.constant 0 : index
    %c0_0 = arith.constant 0 : index
    %0 = vector.load %arg1[%c0, %c0_0] : memref<16x32xbf16, #tpu.memory_space<vmem>>, vector<16x32xbf16>
    %c0_1 = arith.constant 0 : index
    %c0_2 = arith.constant 0 : index
    %1 = vector.load %arg2[%c0_1, %c0_2] : memref<32x128xbf16, #tpu.memory_space<vmem>>, vector<32x128xbf16>
    %cst = arith.constant dense<0.000000e+00> : vector<16x128xf32>
    %2 = tpu.matmul %0, %1, %cst {dimension_numbers = #tpu.dot_dimension_numbers<[1], [0], [0], [1], [0, 0, 1, 1], [], []>} : vector<16x32xbf16>, vector<32x128xbf16>, vector<16x128xf32> -> vector<16x128xf32>
    %c0_3 = arith.constant 0 : index
    %c0_4 = arith.constant 0 : index
    %3 = vector.load %arg3[%c0_3, %c0_4] : memref<1x128xf32, #tpu.memory_space<vmem>>, vector<1x128xf32>
    %4 = vector.broadcast %3 : vector<1x128xf32> to vector<16x128xf32>
    %5 = arith.addf %2, %4 : vector<16x128xf32>
    %cst_5 = arith.constant 0.000000e+00 : f32
    %6 = vector.broadcast %cst_5 : f32 to vector<16x128xf32>
    %7 = arith.maximumf %5, %6 : vector<16x128xf32>
    %8 = arith.truncf %7 : vector<16x128xf32> to vector<16x128xbf16>
    %c0_6 = arith.constant 0 : index
    %c0_7 = arith.constant 0 : index
    %9 = vector.load %arg4[%c0_6, %c0_7] : memref<128x128xbf16, #tpu.memory_space<vmem>>, vector<128x128xbf16>
    %cst_8 = arith.constant dense<0.000000e+00> : vector<16x128xf32>
    %10 = tpu.matmul %8, %9, %cst_8 {dimension_numbers = #tpu.dot_dimension_numbers<[1], [0], [0], [1], [0, 0, 1, 1], [], []>} : vector<16x128xbf16>, vector<128x128xbf16>, vector<16x128xf32> -> vector<16x128xf32>
    %c0_9 = arith.constant 0 : index
    %c0_10 = arith.constant 0 : index
    %11 = vector.load %arg5[%c0_9, %c0_10] : memref<1x128xf32, #tpu.memory_space<vmem>>, vector<1x128xf32>
    %12 = vector.broadcast %11 : vector<1x128xf32> to vector<16x128xf32>
    %13 = arith.addf %10, %12 : vector<16x128xf32>
    %cst_11 = arith.constant 0.000000e+00 : f32
    %14 = vector.broadcast %cst_11 : f32 to vector<16x128xf32>
    %15 = arith.maximumf %13, %14 : vector<16x128xf32>
    %16 = arith.truncf %15 : vector<16x128xf32> to vector<16x128xbf16>
    %c0_12 = arith.constant 0 : index
    %c0_13 = arith.constant 0 : index
    %17 = vector.load %arg6[%c0_12, %c0_13] : memref<128x128xbf16, #tpu.memory_space<vmem>>, vector<128x128xbf16>
    %cst_14 = arith.constant dense<0.000000e+00> : vector<16x128xf32>
    %18 = tpu.matmul %16, %17, %cst_14 {dimension_numbers = #tpu.dot_dimension_numbers<[1], [0], [0], [1], [0, 0, 1, 1], [], []>} : vector<16x128xbf16>, vector<128x128xbf16>, vector<16x128xf32> -> vector<16x128xf32>
    %c0_15 = arith.constant 0 : index
    %c0_16 = arith.constant 0 : index
    %19 = vector.load %arg7[%c0_15, %c0_16] : memref<1x128xf32, #tpu.memory_space<vmem>>, vector<1x128xf32>
    %20 = vector.broadcast %19 : vector<1x128xf32> to vector<16x128xf32>
    %21 = arith.addf %18, %20 : vector<16x128xf32>
    %22 = arith.truncf %21 : vector<16x128xf32> to vector<16x128xbf16>
    %c0_17 = arith.constant 0 : index
    %c0_18 = arith.constant 0 : index
    %23 = vector.load %arg8[%c0_17, %c0_18] : memref<16x128xbf16, #tpu.memory_space<vmem>>, vector<16x128xbf16>
    tpu.vector_store %arg8[%c0_17, %c0_18], %22 {strides = array<i32>} : memref<16x128xbf16, #tpu.memory_space<vmem>>, vector<16x128xbf16>,
    return
  }
  func.func @transform_0(%arg0: i32) -> (i32, i32) {
    %c0_i32 = arith.constant 0 : i32
    %c0_i32_0 = arith.constant 0 : i32
    return %arg0, %c0_i32 : i32, i32
  }
  func.func @transform_1(%arg0: i32) -> (i32, i32) {
    %c0_i32 = arith.constant 0 : i32
    %c0_i32_0 = arith.constant 0 : i32
    %c0_i32_1 = arith.constant 0 : i32
    return %c0_i32, %c0_i32_0 : i32, i32
  }
  func.func @transform_2(%arg0: i32) -> (i32, i32) {
    %c0_i32 = arith.constant 0 : i32
    %c0_i32_0 = arith.constant 0 : i32
    %c0_i32_1 = arith.constant 0 : i32
    return %c0_i32, %c0_i32_0 : i32, i32
  }
  func.func @transform_3(%arg0: i32) -> (i32, i32) {
    %c0_i32 = arith.constant 0 : i32
    %c0_i32_0 = arith.constant 0 : i32
    %c0_i32_1 = arith.constant 0 : i32
    return %c0_i32, %c0_i32_0 : i32, i32
  }
  func.func @transform_4(%arg0: i32) -> (i32, i32) {
    %c0_i32 = arith.constant 0 : i32
    %c0_i32_0 = arith.constant 0 : i32
    %c0_i32_1 = arith.constant 0 : i32
    return %c0_i32, %c0_i32_0 : i32, i32
  }
  func.func @transform_5(%arg0: i32) -> (i32, i32) {
    %c0_i32 = arith.constant 0 : i32
    %c0_i32_0 = arith.constant 0 : i32
    %c0_i32_1 = arith.constant 0 : i32
    return %c0_i32, %c0_i32_0 : i32, i32
  }
  func.func @transform_6(%arg0: i32) -> (i32, i32) {
    %c0_i32 = arith.constant 0 : i32
    %c0_i32_0 = arith.constant 0 : i32
    %c0_i32_1 = arith.constant 0 : i32
    return %c0_i32, %c0_i32_0 : i32, i32
  }
  func.func @transform_7(%arg0: i32) -> (i32, i32) {
    %c0_i32 = arith.constant 0 : i32
    %c0_i32_0 = arith.constant 0 : i32
    return %arg0, %c0_i32 : i32, i32
  }
}

</mosaic_0001>

<bundles_post_ra>
// kernel: tpu_custom_call.1
= control target key start
LH: loop header
LB: loop body
LE: loop exit
PB: predicated region body
PF: predicated region fallthrough
CT: control target
= control target key end

     0   :  { %12 = vsyncpa [#allocation3], 0  ;;  %s835_s0 = inlined_call_operand.hbm [shape: bf16[16,32], index: 0, kind: input, shape index: {}]   ;;  %s836_s1 = inlined_call_operand.hbm [shape: bf16[32,128], index: 1, kind: input, shape index: {}]   ;;  %s837_s2 = inlined_call_operand.vmem [shape: f32[1,128], index: 2, kind: input, shape index: {}]   ;;  %s838_s3 = inlined_call_operand.hbm [shape: bf16[128,128], index: 3, kind: input, shape index: {}]   ;;  %s839_s4 = inlined_call_operand.vmem [shape: f32[1,128], index: 4, kind: input, shape index: {}]   ;;  %s840_s5 = inlined_call_operand.hbm [shape: bf16[128,128], index: 5, kind: input, shape index: {}]   ;;  %s841_s6 = inlined_call_operand.vmem [shape: f32[1,128], index: 6, kind: input, shape index: {}]   ;;  %s842_s7 = inlined_call_operand.hbm [shape: bf16[16,128], index: 7, kind: output, shape index: {}]  }
   0x1   :  { %13 = vsyncpa [#allocation6], 0 }
   0x2   :  { %14 = vsyncpa [#allocation9], 0 }
   0x3   :  { %15 = vsyncpa [#allocation4], 0  ;;  %s664_s24 = smov [#allocation5]   ;;  %s665_s26 = smov [#allocation2]  }
   0x4   :  { %s33_s25 = sshll.u32 %s664_s24, 4  ;;  %s21_s27 = sshll.u32 %s665_s26, 4  ;;  %s34_s25 = int_to_ptr.vmem [resolvable:$true] %s33_s25  ;;  %s713_s27 = int_to_ptr.vmem [resolvable:$true] %s21_s27 }
   0x5   :  { %s546_s30 = scalar_lea.hbm %s836_s1, 256 }
   0x6   :  { %p547_p0 = scmp.ne.s32.totalorder %s836_s1, %s546_s30  ;;  %p550_p1 = scmp.lt.u32.totalorder %s546_s30, %s836_s1 }
   0x8   :  { %p552_p2 = pnand %p550_p1, %p547_p0 }
   0xa   :  { %555 = shalt.err (!%p552_p2)
}
   0xb   :  { %s556_s12 = scalar_lea.vmem %s34_s25, 256  ;;  %p561_p4 = scmp.lt.s32.totalorder %s34_s25, %s34_s25 }
   0xc   :  { %p557_p3 = scmp.ne.s32.totalorder %s34_s25, %s556_s12  ;;  %p562_p5 = scmp.lt.s32.totalorder %s556_s12, %s556_s12 }
   0xe   :  { %p563_p6 = por %p562_p5, %p561_p4 }
  0x10   :  { %p564_p7 = pnand %p563_p6, %p557_p3 }
  0x12   :  { %567 = shalt.err (!%p564_p7)
}
  0x13   :  { %s666_s13 = smov 64   ;;  %s667_s14 = smov 4  }
  0x14   :  { %39 = dma.hbm_to_vmem [thread:$0]  %s836_s1, 256, %s34_s25, [#allocation6], %s666_s13, %s666_s13, %s667_s14  }
  0x15   :  { %s568_s19 = scalar_lea.hbm %s835_s0, 128 }
  0x16   :  { %p569_p8 = scmp.ne.s32.totalorder %s835_s0, %s568_s19  ;;  %p572_p9 = scmp.lt.u32.totalorder %s568_s19, %s835_s0 }
  0x18   :  { %p574_p10 = pnand %p572_p9, %p569_p8 }
  0x1a   :  { %577 = shalt.err (!%p574_p10)
}
  0x1b   :  { %s578_s24 = scalar_lea.vmem %s713_s27, 128  ;;  %p583_p12 = scmp.lt.s32.totalorder %s713_s27, %s713_s27 }
  0x1c   :  { %p579_p11 = scmp.ne.s32.totalorder %s713_s27, %s578_s24  ;;  %p584_p13 = scmp.lt.s32.totalorder %s578_s24, %s578_s24 }
  0x1e   :  { %p585_p0 = por %p584_p13, %p583_p12 }
  0x20   :  { %p586_p1 = pnand %p585_p0, %p579_p11 }
  0x22   :  { %589 = shalt.err (!%p586_p1)
}
  0x23   :  { %27 = dma.hbm_to_vmem [thread:$0]  %s835_s0, 128, %s713_s27, [#allocation3], %s666_s13, %s666_s13, %s667_s14  }
  0x24   :  { %s668_s26 = smov [#allocation7]   ;;  %s669_s29 = smov [#allocation8]  }
  0x25   :  { %s47_s28 = sshll.u32 %s668_s26, 4  ;;  %s61_s30 = sshll.u32 %s669_s29, 4  ;;  %s48_s28 = int_to_ptr.vmem [resolvable:$true] %s47_s28  ;;  %s750_s30 = int_to_ptr.vmem [resolvable:$true] %s61_s30 }
  0x26   :  { %s590_s10 = scalar_lea.hbm %s838_s3, 1024 }
  0x27   :  { %p591_p2 = scmp.ne.s32.totalorder %s838_s3, %s590_s10  ;;  %p594_p3 = scmp.lt.u32.totalorder %s590_s10, %s838_s3 }
  0x29   :  { %p596_p4 = pnand %p594_p3, %p591_p2 }
  0x2b   :  { %599 = shalt.err (!%p596_p4)
}
  0x2c   :  { %s600_s0 = scalar_lea.vmem %s48_s28, 1024  ;;  %p605_p6 = scmp.lt.s32.totalorder %s48_s28, %s48_s28 }
  0x2d   :  { %p601_p5 = scmp.ne.s32.totalorder %s48_s28, %s600_s0  ;;  %p606_p7 = scmp.lt.s32.totalorder %s600_s0, %s600_s0 }
  0x2f   :  { %p607_p8 = por %p606_p7, %p605_p6 }
  0x31   :  { %p608_p9 = pnand %p607_p8, %p601_p5 }
  0x33   :  { %611 = shalt.err (!%p608_p9)
}
  0x34   :  { %53 = dma.hbm_to_vmem [thread:$0]  %s838_s3, 1024, %s48_s28, [#allocation6], %s666_s13, %s666_s13, %s667_s14  }
  0x35   :  { %s612_s20 = scalar_lea.hbm %s840_s5, 1024 }
  0x36   :  { %p613_p10 = scmp.ne.s32.totalorder %s840_s5, %s612_s20  ;;  %p616_p11 = scmp.lt.u32.totalorder %s612_s20, %s840_s5 }
  0x38   :  { %p618_p12 = pnand %p616_p11, %p613_p10 }
  0x3a   :  { %621 = shalt.err (!%p618_p12)
}
  0x3b   :  { %s622_s1 = scalar_lea.vmem %s750_s30, 1024  ;;  %p627_p0 = scmp.lt.s32.totalorder %s750_s30, %s750_s30 }
  0x3c   :  { %p623_p13 = scmp.ne.s32.totalorder %s750_s30, %s622_s1  ;;  %p628_p1 = scmp.lt.s32.totalorder %s622_s1, %s622_s1 }
  0x3e   :  { %p629_p2 = por %p628_p1, %p627_p0 }
  0x40   :  { %p630_p3 = pnand %p629_p2, %p623_p13 }
  0x42   :  { %633 = shalt.err (!%p630_p3)
}
  0x43   :  { %67 = dma.hbm_to_vmem [thread:$0]  %s840_s5, 1024, %s750_s30, [#allocation9], %s666_s13, %s666_s13, %s667_s14  }
  0x44   :  { %656 = dma.done.wait [#allocation3], 128  }
  0x45   :  { %657 = vsyncadd [#allocation3], 4294967168 }
  0x46   :  { %658 = dma.done.wait [#allocation6], 1280  }
  0x47   :  { %659 = vsyncadd [#allocation6], 4294966016 }
  0x48   :  { %660 = dma.done.wait [#allocation9], 1024  }
  0x49   :  { %661 = vsyncadd [#allocation9], 4294966272  ;;  %v670_v0 = vmov 0.0   ;;  %vm671_vm0 = vmmov 0   ;;  %v527_v1 = vld [vmem:[#allocation5] sm:$0xff]   ;;  %v528_v2 = vld [vmem:[#allocation5 + $0x8] sm:$0xff]  }
  0x4a   :  { %470 = vmatprep.subr.bf16.mxu0 %v670_v0  ;;  %474 = vmatprep.mubr.msk.bf16.mxu0 %vm671_vm0, %v670_v0  ;;  %v530_v3 = vld [vmem:[#allocation7] sm:$0xff]   ;;  %v529_v4 = vld [vmem:[#allocation2] sm:$0xff]   ;;  %vm113_vm1 = vcmask 261120   ;;  %v532_v6 = vld [vmem:[#allocation7 + $0x10] sm:$0xff]   ;;  %s672_s8 = smov [#allocation10]  }
  0x4b   :  { %478 = vmatprep.subr.bf16.mxu1 %v670_v0  ;;  %494 = vmatprep.mubr.msk.bf16.mxu1 %vm671_vm0, %v670_v0  ;;  %v531_v5 = vld [vmem:[#allocation7 + $0x8] sm:$0xff]   ;;  %v533_v7 = vld [vmem:[#allocation7 + $0x18] sm:$0xff]   ;;  %v534_v8 = vld [vmem:[#allocation7 + $0x20] sm:$0xff]   ;;  %s403_s9 = sshll.u32 %s672_s8, 4  ;;  %s404_s9 = int_to_ptr.vmem [resolvable:$true] %s403_s9 }
  0x4c   :  { %471 = vmatpush3.bf16.msra.mxu0 %v527_v1  ;;  %479 = vmatpush3.bf16.msra.mxu1 %v530_v3  ;;  %v535_v9 = vld [vmem:[#allocation7 + $0x28] sm:$0xff]   ;;  %v536_v10 = vld [vmem:[#allocation7 + $0x30] sm:$0xff]   ;;  %v537_v11 = vld [vmem:[#allocation7 + $0x38] sm:$0xff]   ;;  %p639_p5 = scmp.lt.s32.totalorder %s404_s9, %s404_s9 }
  0x4d   :  { %472 = vmatprep.subr.bf16.mxu0 %v670_v0  ;;  %480 = vmatprep.subr.bf16.mxu1 %v670_v0  ;;  %v538_v12 = vld [vmem:[#allocation8] sm:$0xff]   ;;  %v539_v13 = vld [vmem:[#allocation8 + $0x8] sm:$0xff]   ;;  %v540_v14 = vld [vmem:[#allocation8 + $0x10] sm:$0xff]  }
  0x4e   :  { %v541_v15 = vld [vmem:[#allocation8 + $0x18] sm:$0xff]   ;;  %v542_v16 = vld [vmem:[#allocation8 + $0x20] sm:$0xff]   ;;  %v543_v17 = vld [vmem:[#allocation8 + $0x28] sm:$0xff]  }
  0x4f   :  { %v417_v18 = vld [vmem:[%s837_s2] ss:$0 sm:$0xff]  ;;  %v544_v28 = vld [vmem:[#allocation8 + $0x30] sm:$0xff]   ;;  %v545_v29 = vld [vmem:[#allocation8 + $0x38] sm:$0xff]  }
  0x50   :  { %473 = vmatpush3.bf16.msra.mxu0 %v528_v2  ;;  %481 = vmatpush3.bf16.msra.mxu1 %v531_v5  ;;  %v422_v30 = vld [vmem:[%s839_s4] ss:$0 sm:$0xff]  ;;  %s634_s4 = scalar_lea.vmem %s404_s9, 128 }
  0x51   :  { %498 = vmatprep.subr.bf16.mxu0 %v670_v0  ;;  %482 = vmatprep.subr.bf16.mxu1 %v670_v0  ;;  %v431_v40 = vld [vmem:[%s841_s6] ss:$0 sm:$0xff]  ;;  %p635_p4 = scmp.ne.s32.totalorder %s404_s9, %s634_s4  ;;  %p640_p6 = scmp.lt.s32.totalorder %s634_s4, %s634_s4 }
  0x53   :  { %475 = vmatmul.mubr.msk.bf16.vlgmr.msra.gmra.mrb[0].mxu0 %vm113_vm1, %v529_v4  ;;  %p641_p7 = por %p640_p6, %p639_p5 }
  0x54   :  { %514 = vmatprep.mubr.msk.bf16.mxu0 %vm671_vm0, %v670_v0  ;;  %483 = vmatpush3.bf16.msra.mxu1 %v532_v6 }
  0x55   :  { %484 = vmatprep.subr.bf16.mxu1 %v670_v0  ;;  %499 = vmatpush3.bf16.msra.mxu0 %v538_v12  ;;  %p642_p8 = pnand %p641_p7, %p635_p4 }
  0x56   :  { %500 = vmatprep.subr.bf16.mxu0 %v670_v0 }
  0x58   :  { %485 = vmatpush3.bf16.msra.mxu1 %v533_v7 }
  0x59   :  { %486 = vmatprep.subr.bf16.mxu1 %v670_v0  ;;  %501 = vmatpush3.bf16.msra.mxu0 %v539_v13 }
  0x5a   :  { %502 = vmatprep.subr.bf16.mxu0 %v670_v0 }
  0x5c   :  { %487 = vmatpush3.bf16.msra.mxu1 %v534_v8 }
  0x5d   :  { %488 = vmatprep.subr.bf16.mxu1 %v670_v0  ;;  %503 = vmatpush3.bf16.msra.mxu0 %v540_v14 }
  0x5e   :  { %504 = vmatprep.subr.bf16.mxu0 %v670_v0 }
  0x60   :  { %489 = vmatpush3.bf16.msra.mxu1 %v535_v9 }
  0x61   :  { %490 = vmatprep.subr.bf16.mxu1 %v670_v0  ;;  %505 = vmatpush3.bf16.msra.mxu0 %v541_v15 }
  0x62   :  { %506 = vmatprep.subr.bf16.mxu0 %v670_v0 }
  0x64   :  { %491 = vmatpush3.bf16.msra.mxu1 %v536_v10 }
  0x65   :  { %492 = vmatprep.subr.bf16.mxu1 %v670_v0  ;;  %507 = vmatpush3.bf16.msra.mxu0 %v542_v16 }
  0x66   :  { %508 = vmatprep.subr.bf16.mxu0 %v670_v0 }
  0x68   :  { %493 = vmatpush3.bf16.msra.mxu1 %v537_v11 }
  0x69   :  { %509 = vmatpush3.bf16.msra.mxu0 %v543_v17 }
  0x6a   :  { %510 = vmatprep.subr.bf16.mxu0 %v670_v0 }
  0x6d   :  { %511 = vmatpush3.bf16.msra.mxu0 %v544_v28 }
  0x6e   :  { %512 = vmatprep.subr.bf16.mxu0 %v670_v0 }
  0x71   :  { %513 = vmatpush3.bf16.msra.mxu0 %v545_v29 }
 0x126   :  { %v151_v19 = vpop.f32.mrb[0].mxu0 }
 0x127   :  { %v152_v20 = vadd.f32 %v417_v18, %v151_v19  ;;  %v476_v21 = vpop.f32.mrb[1].mxu0 }
 0x128   :  { %v154_v22 = vpop.f32.mrb[2].mxu0 }
 0x129   :  { %v155_v23 = vadd.f32 %v417_v18, %v154_v22  ;;  %v477_v24 = vpop.f32.mrb[3].mxu0  ;;  %v158_v25 = vmax.f32 %v152_v20, 0.0 }
 0x12b   :  { %v159_v26 = vmax.f32 %v155_v23, 0.0 }
 0x12d   :  { %v160_v27 = vpack.c.bf16 %v159_v26, %v158_v25 }
 0x12f   :  { %495 = vmatmul.mubr.bf16.vlgmr.msra.gmra.mrb[0].mxu1 %v160_v27 }
 0x202   :  { %v266_v31 = vpop.f32.mrb[0].mxu1 }
 0x203   :  { %v267_v32 = vadd.f32 %v422_v30, %v266_v31  ;;  %v496_v33 = vpop.f32.mrb[1].mxu1 }
 0x204   :  { %v269_v34 = vpop.f32.mrb[2].mxu1 }
 0x205   :  { %v270_v35 = vadd.f32 %v422_v30, %v269_v34  ;;  %v497_v36 = vpop.f32.mrb[3].mxu1  ;;  %v273_v37 = vmax.f32 %v267_v32, 0.0 }
 0x207   :  { %v274_v38 = vmax.f32 %v270_v35, 0.0 }
 0x209   :  { %v275_v39 = vpack.c.bf16 %v274_v38, %v273_v37 }
 0x20b   :  { %515 = vmatmul.mubr.bf16.vlgmr.msra.gmra.mrb[4].mxu0 %v275_v39 }
 0x2de   :  { %v381_v41 = vpop.f32.mrb[4].mxu0 }
 0x2df   :  { %v516_v42 = vpop.f32.mrb[5].mxu0  ;;  %v382_v44 = vadd.f32 %v431_v40, %v381_v41 }
 0x2e0   :  { %v384_v43 = vpop.f32.mrb[6].mxu0 }
 0x2e1   :  { %v385_v45 = vadd.f32 %v431_v40, %v384_v43  ;;  %v517_v46 = vpop.f32.mrb[7].mxu0 }
 0x2e3   :  { %v447_v47 = vpack.c.bf16 %v385_v45, %v382_v44 }
 0x2e5   :  { %448 = vst [vmem:[#allocation10] sm:$0xff] %v447_v47  }
 0x2e6   :  { %645 = shalt.err (!%p642_p8)
}
 0x2e7   :  { %s646_s11 = scalar_lea.hbm %s842_s7, 128 }
 0x2e8   :  { %p647_p9 = scmp.ne.s32.totalorder %s842_s7, %s646_s11  ;;  %p650_p10 = scmp.lt.u32.totalorder %s646_s11, %s842_s7 }
 0x2ea   :  { %p652_p11 = pnand %p650_p10, %p647_p9 }
 0x2ec   :  { %655 = shalt.err (!%p652_p11)
}
 0x2ed   :  { %409 = dma.vmem_to_hbm [thread:$0]  %s404_s9, 128, %s842_s7, [#allocation4], %s666_s13, %s666_s13, %s667_s14  }
 0x2ee   :  { %662 = dma.done.wait [#allocation4], 128  }
 0x2ef   :  { %663 = vsyncadd [#allocation4], 4294967168 }
 0x2f0   :  { %413 = vsyncpa [#allocation3], 1 }
 0x2f1   :  { %414 = vsyncpa [#allocation6], 1 }
 0x2f2   :  { %415 = vsyncpa [#allocation9], 1 }
 0x2f3   :  { %416 = vsyncpa [#allocation4], 1 }

</bundles_post_ra>
